<compile_context>
chip_gen: v7x
topology: tpu7x:2x2x1
jax: 0.10.0
libtpu: 0.0.40
codegen_flags: <defaults>
</compile_context>

<pallas_src>
import functools
import math

import jax
import jax.numpy as jnp
from jax.experimental import pallas as pl
from jax.experimental.pallas import tpu as pltpu

LN_EPS = 1e-5  # torch nn.LayerNorm default


# ---------------------------------------------------------------------------
# In-kernel helpers (fp32 math)
# ---------------------------------------------------------------------------
def _layernorm_f32(x, g, b):
    mu = jnp.mean(x, axis=-1, keepdims=True)
    xc = x - mu
    var = jnp.mean(xc * xc, axis=-1, keepdims=True)
    return xc * jax.lax.rsqrt(var + LN_EPS) * g + b


def _gelu_erf(x):
    # exact erf-based GELU, matching torch.nn.GELU() default
    return 0.5 * x * (1.0 + jax.lax.erf(x * (1.0 / math.sqrt(2.0))))


def _gelu_tanh(x):
    # tanh-approx fallback (only used if lax.erf has no Mosaic lowering)
    c = math.sqrt(2.0 / math.pi)
    return 0.5 * x * (1.0 + jnp.tanh(c * (x + 0.044715 * x * x * x)))


@functools.lru_cache(maxsize=None)
def _erf_lowers_in_pallas():
    """Probe (compile-only, cached) whether lax.erf lowers inside a Pallas TPU kernel."""
    def k(x_ref, o_ref):
        o_ref[...] = jax.lax.erf(x_ref[...])
    x = jnp.zeros((8, 128), jnp.float32)
    try:
        jax.jit(pl.pallas_call(
            k, out_shape=jax.ShapeDtypeStruct((8, 128), jnp.float32))).lower(x).compile()
        return True
    except Exception:
        return False


# ---------------------------------------------------------------------------
# Pallas kernel: one transformer block (PreNorm-Attn + res, PreNorm-FF + res)
# for a single batch element.  Grid iterates over batch ("parallel").
# ---------------------------------------------------------------------------
def transformer_block_kernel(
    x_ref,
    ln1g_ref, ln1b_ref, wqkv_ref, wo_ref, bo_ref,
    ln2g_ref, ln2b_ref, w1_ref, b1_ref, w2_ref, b2_ref,
    out_ref,
    *, heads, dim_head, use_erf_gelu,
):
    f32, bf16 = jnp.float32, jnp.bfloat16
    inner = heads * dim_head

    x = x_ref[0]                                                    # (N, D) f32

    # ---- PreNorm + Multi-head Attention + residual ------------------------
    xn = _layernorm_f32(x, ln1g_ref[...], ln1b_ref[...])            # (N, D) f32

    # One fused lane-dense QKV projection (softmax scale pre-folded into the
    # query columns of wqkv).  bf16 operands, fp32 MXU accumulation.
    qkv = jnp.dot(xn.astype(bf16), wqkv_ref[...],
                  preferred_element_type=f32)                       # (N, 3*inner) f32

    def carve_heads(base):
        # (N, 3*inner) lanes -> (heads, N, dim_head): static lane slices plus a
        # leading-axis stack (pure data movement; no per-head matmuls, no H-wide
        # activation copies).
        return jnp.stack(
            [qkv[:, base + h * dim_head: base + (h + 1) * dim_head]
             for h in range(heads)], axis=0).astype(bf16)

    q = carve_heads(0)                                              # (H, N, dh) bf16
    k = carve_heads(inner)
    v = carve_heads(2 * inner)

    # TODO(synk): flash-style query/KV tiling (online softmax) for long sequences.
    dots = jnp.einsum("hqd,hkd->hqk", q, k,
                      preferred_element_type=f32)                   # (H, N, N) f32
    m = jnp.max(dots, axis=-1, keepdims=True)
    p = jnp.exp(dots - m)
    denom = jnp.sum(p, axis=-1, keepdims=True)
    # Normalize with EUP reciprocal and cast straight to bf16: the fp32 copy of the
    # normalized scores is never materialized.
    p = (p * pl.reciprocal(denom, approx=True)).astype(bf16)        # (H, N, N) bf16

    o = jnp.einsum("hqk,hkd->hqd", p, v,
                   preferred_element_type=f32)                      # (H, N, dh) f32

    # Merge heads back into lanes and apply ONE (N, inner) @ (inner, D) output
    # projection: the head reduction happens inside the MXU contraction (K = inner),
    # no (H, N, D) f32 intermediate, no VPU head-sum.
    o_cat = jnp.concatenate([o[h] for h in range(heads)], axis=-1)  # (N, inner) f32
    attn = jnp.dot(o_cat.astype(bf16), wo_ref[...],
                   preferred_element_type=f32)                      # (N, D) f32
    x = x + attn + bo_ref[...]

    # ---- PreNorm + FeedForward + residual ----------------------------------
    xn2 = _layernorm_f32(x, ln2g_ref[...], ln2b_ref[...])
    h1 = jnp.dot(xn2.astype(bf16), w1_ref[...],
                 preferred_element_type=f32) + b1_ref[...]
    h1 = _gelu_erf(h1) if use_erf_gelu else _gelu_tanh(h1)
    h2 = jnp.dot(h1.astype(bf16), w2_ref[...],
                 preferred_element_type=f32) + b2_ref[...]
    out_ref[0] = (x + h2).astype(out_ref.dtype)


# ---------------------------------------------------------------------------
# Wrapper: weight prep (scale folding, bf16 cast) + pallas_call
# ---------------------------------------------------------------------------
def _prep_layer(p, *, heads, dim_head):
    inner = heads * dim_head
    scale = dim_head ** (-0.5)
    bf = jnp.bfloat16
    # Fold the softmax scale into the query columns of the fused QKV weight
    # (zero in-kernel cost; applied before the bf16 cast).
    wqkv = p["wqkv"].at[:, :inner].multiply(scale)
    return dict(
        ln1_g=p["ln1_g"], ln1_b=p["ln1_b"],
        wqkv=wqkv.astype(bf),             # (D, 3*inner) lane-dense fused projection
        wo=p["wo"].astype(bf),            # (inner, D)
        bo=p["bo"],
        ln2_g=p["ln2_g"], ln2_b=p["ln2_b"],
        w1=p["w1"].astype(bf), b1=p["b1"],
        w2=p["w2"].astype(bf), b2=p["b2"],
    )


def _vmem_limit_bytes():
    # ~85% of physical VMEM (headroom for Mosaic scratch / pipeline buffers on
    # 64 MiB v7x), capped at 100 MiB on 128 MiB v5e/v6e.
    try:
        cap = int(pltpu.get_tpu_info().vmem_capacity_bytes)
    except Exception:
        cap = 64 * 1024 * 1024
    return max(min(int(cap * 0.85), 100 * 1024 * 1024), 32 * 1024 * 1024)


def transformer_block(x, prepped, *, heads, dim_head, use_erf_gelu):
    B, N, D = x.shape
    inner = heads * dim_head
    mlp_dim = prepped["w1"].shape[1]
    kernel = functools.partial(transformer_block_kernel, heads=heads,
                               dim_head=dim_head, use_erf_gelu=use_erf_gelu)

    weight_names = ("ln1_g", "ln1_b", "wqkv", "wo", "bo",
                    "ln2_g", "ln2_b", "w1", "b1", "w2", "b2")
    weights = [prepped[k] for k in weight_names]

    # Grid-invariant weights: whole-array VMEM residents (single buffer, one DMA)
    # instead of per-grid-step double-buffered pipeline blocks.
    def weight_spec():
        return pl.BlockSpec(memory_space=pltpu.MemorySpace.VMEM)

    flops = 2 * B * N * (3 * D * inner       # fused QKV projection
                         + 2 * N * inner     # q@k^T and p@v
                         + inner * D         # output projection
                         + 2 * D * mlp_dim)  # feed-forward
    transcendentals = B * N * (heads * N + mlp_dim)
    bytes_accessed = (2 * int(x.size) * 4
                      + sum(int(w.size) * w.dtype.itemsize for w in weights))

    # TODO(synk): on v7x split attention and feed-forward into two pallas_calls (or
    # add an N-row tile axis) so their weights/intermediates are never co-resident.
    return pl.pallas_call(
        kernel,
        out_shape=jax.ShapeDtypeStruct((B, N, D), x.dtype),
        grid=(B,),
        in_specs=[pl.BlockSpec((1, N, D), lambda b: (b, 0, 0))]
                 + [weight_spec() for _ in weights],
        out_specs=pl.BlockSpec((1, N, D), lambda b: (b, 0, 0)),
        compiler_params=pltpu.CompilerParams(
            dimension_semantics=("parallel",),
            vmem_limit_bytes=_vmem_limit_bytes()),
        cost_estimate=pl.CostEstimate(
            flops=flops, transcendentals=transcendentals,
            bytes_accessed=bytes_accessed),
    )(x, *weights)


def transformer_forward(x, layer_params, *, heads, dim_head):
    use_erf = _erf_lowers_in_pallas()
    # TODO(synk): cross-call prefetch of the next layer's weights (DMA + semaphore
    # futures) to hide per-layer weight HBM->VMEM copies on v5e.
    for p in layer_params:
        prepped = _prep_layer(p, heads=heads, dim_head=dim_head)
        x = transformer_block(x, prepped, heads=heads, dim_head=dim_head,
                              use_erf_gelu=use_erf)
    return x


# ---------------------------------------------------------------------------
# Deterministic parameter init (shapes from the PyTorch module's __init__)
# ---------------------------------------------------------------------------
def init_params(key, dim, depth, heads, dim_head, mlp_dim):
    inner = heads * dim_head
    layers = []
    for _ in range(depth):
        key, k0, k1, k2, k3 = jax.random.split(key, 5)
        layers.append(dict(
            ln1_g=jnp.ones((1, dim), jnp.float32),
            ln1_b=jnp.zeros((1, dim), jnp.float32),
            wqkv=0.02 * jax.random.normal(k0, (dim, inner * 3), jnp.float32),
            wo=0.02 * jax.random.normal(k1, (inner, dim), jnp.float32),
            bo=jnp.zeros((1, dim), jnp.float32),
            ln2_g=jnp.ones((1, dim), jnp.float32),
            ln2_b=jnp.zeros((1, dim), jnp.float32),
            w1=0.02 * jax.random.normal(k2, (dim, mlp_dim), jnp.float32),
            b1=jnp.zeros((1, mlp_dim), jnp.float32),
            w2=0.02 * jax.random.normal(k3, (mlp_dim, dim), jnp.float32),
            b2=jnp.zeros((1, dim), jnp.float32),
        ))
    return layers


# ---------------------------------------------------------------------------
# Pure-JAX fp32 reference (mirrors the PyTorch forward) for correctness check
# ---------------------------------------------------------------------------
def ref_block(x, p, *, heads, dim_head):
    B, N, D = x.shape
    inner = heads * dim_head
    scale = dim_head ** (-0.5)

    def ln(t, g, b):
        mu = t.mean(-1, keepdims=True)
        var = ((t - mu) ** 2).mean(-1, keepdims=True)
        return (t - mu) / jnp.sqrt(var + LN_EPS) * g[0] + b[0]

    xn = ln(x, p["ln1_g"], p["ln1_b"])
    qkv = xn @ p["wqkv"]
    q, k, v = jnp.split(qkv, 3, axis=-1)
    rs = lambda t: t.reshape(B, N, heads, dim_head).transpose(0, 2, 1, 3)
    q, k, v = rs(q), rs(k), rs(v)
    dots = jnp.einsum("bhid,bhjd->bhij", q, k) * scale
    attn = jax.nn.softmax(dots, axis=-1)
    o = jnp.einsum("bhij,bhjd->bhid", attn, v)
    o = o.transpose(0, 2, 1, 3).reshape(B, N, inner)
    x = x + o @ p["wo"] + p["bo"][0]

    xn2 = ln(x, p["ln2_g"], p["ln2_b"])
    h1 = xn2 @ p["w1"] + p["b1"][0]
    h1 = 0.5 * h1 * (1.0 + jax.scipy.special.erf(h1 / jnp.sqrt(2.0)))
    x = x + h1 @ p["w2"] + p["b2"][0]
    return x


def ref_forward(x, layer_params, *, heads, dim_head):
    for p in layer_params:
        x = ref_block(x, p, heads=heads, dim_head=dim_head)
    return x


if __name__ == "__main__":
    # Small shapes consistent with Transformer(dim, depth, heads, dim_head, mlp_dim)
    B, N = 2, 8
    dim, depth, heads, dim_head, mlp_dim = 32, 2, 4, 16, 64

    key = jax.random.PRNGKey(0)
    key, xk = jax.random.split(key)
    x = jax.random.normal(xk, (B, N, dim), jnp.float32)
    params = init_params(key, dim, depth, heads, dim_head, mlp_dim)

    out = transformer_forward(x, params, heads=heads, dim_head=dim_head)
    out = jax.block_until_ready(out)

    ref = ref_forward(x, params, heads=heads, dim_head=dim_head)
    assert out.shape == (B, N, dim)
    # Tolerance covers bf16 MXU inputs + approx reciprocal (reference is pure fp32).
    max_err = float(jnp.max(jnp.abs(out - ref)))
    assert jnp.allclose(out, ref, rtol=2e-2, atol=2e-2), (
        f"Pallas output mismatch vs JAX reference (max abs err={max_err})")

    print("KERNEL_OK")
</pallas_src>

<mosaic_0001>
module attributes {stable_mosaic.version = 11 : i64} {
  func.func @transformer_block_kernel(%arg0: i32, %arg1: memref<1x8x32xf32, #tpu.memory_space<vmem>>, %arg2: memref<1x32xf32, #tpu.memory_space<vmem>>, %arg3: memref<1x32xf32, #tpu.memory_space<vmem>>, %arg4: memref<32x192xbf16, #tpu.memory_space<vmem>>, %arg5: memref<64x32xbf16, #tpu.memory_space<vmem>>, %arg6: memref<1x32xf32, #tpu.memory_space<vmem>>, %arg7: memref<1x32xf32, #tpu.memory_space<vmem>>, %arg8: memref<1x32xf32, #tpu.memory_space<vmem>>, %arg9: memref<32x64xbf16, #tpu.memory_space<vmem>>, %arg10: memref<1x64xf32, #tpu.memory_space<vmem>>, %arg11: memref<64x32xbf16, #tpu.memory_space<vmem>>, %arg12: memref<1x32xf32, #tpu.memory_space<vmem>>, %arg13: memref<1x8x32xf32, #tpu.memory_space<vmem>>) attributes {dimension_semantics = [#tpu.dimension_semantics<parallel>], iteration_bounds = array<i64: 2>, scalar_prefetch = 0 : i64, scratch_operands = 0 : i64, tpu.core_type = #tpu.core_type<tc>, window_params = [{transform_indices = @transform_0, window_bounds = array<i64: 1, 8, 32>}, {pipeline_mode = #tpu.pipeline_mode<synchronous>, transform_indices = @transform_1, window_bounds = array<i64: 1, 32>}, {pipeline_mode = #tpu.pipeline_mode<synchronous>, transform_indices = @transform_2, window_bounds = array<i64: 1, 32>}, {pipeline_mode = #tpu.pipeline_mode<synchronous>, transform_indices = @transform_3, window_bounds = array<i64: 32, 192>}, {pipeline_mode = #tpu.pipeline_mode<synchronous>, transform_indices = @transform_4, window_bounds = array<i64: 64, 32>}, {pipeline_mode = #tpu.pipeline_mode<synchronous>, transform_indices = @transform_5, window_bounds = array<i64: 1, 32>}, {pipeline_mode = #tpu.pipeline_mode<synchronous>, transform_indices = @transform_6, window_bounds = array<i64: 1, 32>}, {pipeline_mode = #tpu.pipeline_mode<synchronous>, transform_indices = @transform_7, window_bounds = array<i64: 1, 32>}, {pipeline_mode = #tpu.pipeline_mode<synchronous>, transform_indices = @transform_8, window_bounds = array<i64: 32, 64>}, {pipeline_mode = #tpu.pipeline_mode<synchronous>, transform_indices = @transform_9, window_bounds = array<i64: 1, 64>}, {pipeline_mode = #tpu.pipeline_mode<synchronous>, transform_indices = @transform_10, window_bounds = array<i64: 64, 32>}, {pipeline_mode = #tpu.pipeline_mode<synchronous>, transform_indices = @transform_11, window_bounds = array<i64: 1, 32>}, {transform_indices = @transform_12, window_bounds = array<i64: 1, 8, 32>}]} {
    %c0 = arith.constant 0 : index
    %c0_0 = arith.constant 0 : index
    %c0_1 = arith.constant 0 : index
    %0 = vector.load %arg1[%c0, %c0_0, %c0_1] : memref<1x8x32xf32, #tpu.memory_space<vmem>>, vector<1x8x32xf32>
    %1 = vector.shape_cast %0 : vector<1x8x32xf32> to vector<8x32xf32>
    %c0_2 = arith.constant 0 : index
    %c0_3 = arith.constant 0 : index
    %2 = vector.load %arg2[%c0_2, %c0_3] : memref<1x32xf32, #tpu.memory_space<vmem>>, vector<1x32xf32>
    %c0_4 = arith.constant 0 : index
    %c0_5 = arith.constant 0 : index
    %3 = vector.load %arg3[%c0_4, %c0_5] : memref<1x32xf32, #tpu.memory_space<vmem>>, vector<1x32xf32>
    %cst = arith.constant dense<0.000000e+00> : vector<8xf32>
    %4 = vector.multi_reduction <add>, %1, %cst [1] : vector<8x32xf32> to vector<8xf32>
    %5 = vector.shape_cast %4 : vector<8xf32> to vector<8x1xf32>
    %cst_6 = arith.constant 3.200000e+01 : f32
    %6 = vector.broadcast %cst_6 : f32 to vector<8x1xf32>
    %7 = arith.divf %5, %6 : vector<8x1xf32>
    %8 = vector.broadcast %7 : vector<8x1xf32> to vector<8x32xf32>
    %9 = arith.subf %1, %8 : vector<8x32xf32>
    %10 = arith.mulf %9, %9 : vector<8x32xf32>
    %cst_7 = arith.constant dense<0.000000e+00> : vector<8xf32>
    %11 = vector.multi_reduction <add>, %10, %cst_7 [1] : vector<8x32xf32> to vector<8xf32>
    %12 = vector.shape_cast %11 : vector<8xf32> to vector<8x1xf32>
    %cst_8 = arith.constant 3.200000e+01 : f32
    %13 = vector.broadcast %cst_8 : f32 to vector<8x1xf32>
    %14 = arith.divf %12, %13 : vector<8x1xf32>
    %cst_9 = arith.constant 9.99999974E-6 : f32
    %15 = vector.broadcast %cst_9 : f32 to vector<8x1xf32>
    %16 = arith.addf %14, %15 : vector<8x1xf32>
    %17 = math.rsqrt %16 : vector<8x1xf32>
    %18 = vector.broadcast %17 : vector<8x1xf32> to vector<8x32xf32>
    %19 = arith.mulf %9, %18 : vector<8x32xf32>
    %20 = vector.broadcast %2 : vector<1x32xf32> to vector<8x32xf32>
    %21 = arith.mulf %19, %20 : vector<8x32xf32>
    %22 = vector.broadcast %3 : vector<1x32xf32> to vector<8x32xf32>
    %23 = arith.addf %21, %22 : vector<8x32xf32>
    %24 = arith.truncf %23 : vector<8x32xf32> to vector<8x32xbf16>
    %c0_10 = arith.constant 0 : index
    %c0_11 = arith.constant 0 : index
    %25 = vector.load %arg4[%c0_10, %c0_11] : memref<32x192xbf16, #tpu.memory_space<vmem>>, vector<32x192xbf16>
    %cst_12 = arith.constant dense<0.000000e+00> : vector<8x192xf32>
    %26 = tpu.matmul %24, %25, %cst_12 {dimension_numbers = #tpu.dot_dimension_numbers<[1], [0], [0], [1], [0, 0, 1, 1], [], []>} : vector<8x32xbf16>, vector<32x192xbf16>, vector<8x192xf32> -> vector<8x192xf32>
    %27 = vector.extract_strided_slice %26 {offsets = [0, 0], sizes = [8, 16], strides = [1, 1]} : vector<8x192xf32> to vector<8x16xf32>
    %28 = vector.extract_strided_slice %26 {offsets = [0, 16], sizes = [8, 16], strides = [1, 1]} : vector<8x192xf32> to vector<8x16xf32>
    %29 = vector.extract_strided_slice %26 {offsets = [0, 32], sizes = [8, 16], strides = [1, 1]} : vector<8x192xf32> to vector<8x16xf32>
    %30 = vector.extract_strided_slice %26 {offsets = [0, 48], sizes = [8, 16], strides = [1, 1]} : vector<8x192xf32> to vector<8x16xf32>
    %31 = vector.shape_cast %27 : vector<8x16xf32> to vector<1x8x16xf32>
    %32 = vector.shape_cast %28 : vector<8x16xf32> to vector<1x8x16xf32>
    %33 = vector.shape_cast %29 : vector<8x16xf32> to vector<1x8x16xf32>
    %34 = vector.shape_cast %30 : vector<8x16xf32> to vector<1x8x16xf32>
    %35 = tpu.concatenate %31, %32, %33, %34 in 0 : vector<1x8x16xf32>, vector<1x8x16xf32>, vector<1x8x16xf32>, vector<1x8x16xf32> -> vector<4x8x16xf32>
    %36 = arith.truncf %35 : vector<4x8x16xf32> to vector<4x8x16xbf16>
    %37 = vector.extract_strided_slice %26 {offsets = [0, 64], sizes = [8, 16], strides = [1, 1]} : vector<8x192xf32> to vector<8x16xf32>
    %38 = vector.extract_strided_slice %26 {offsets = [0, 80], sizes = [8, 16], strides = [1, 1]} : vector<8x192xf32> to vector<8x16xf32>
    %39 = vector.extract_strided_slice %26 {offsets = [0, 96], sizes = [8, 16], strides = [1, 1]} : vector<8x192xf32> to vector<8x16xf32>
    %40 = vector.extract_strided_slice %26 {offsets = [0, 112], sizes = [8, 16], strides = [1, 1]} : vector<8x192xf32> to vector<8x16xf32>
    %41 = vector.shape_cast %37 : vector<8x16xf32> to vector<1x8x16xf32>
    %42 = vector.shape_cast %38 : vector<8x16xf32> to vector<1x8x16xf32>
    %43 = vector.shape_cast %39 : vector<8x16xf32> to vector<1x8x16xf32>
    %44 = vector.shape_cast %40 : vector<8x16xf32> to vector<1x8x16xf32>
    %45 = tpu.concatenate %41, %42, %43, %44 in 0 : vector<1x8x16xf32>, vector<1x8x16xf32>, vector<1x8x16xf32>, vector<1x8x16xf32> -> vector<4x8x16xf32>
    %46 = arith.truncf %45 : vector<4x8x16xf32> to vector<4x8x16xbf16>
    %47 = vector.extract_strided_slice %26 {offsets = [0, 128], sizes = [8, 16], strides = [1, 1]} : vector<8x192xf32> to vector<8x16xf32>
    %48 = vector.extract_strided_slice %26 {offsets = [0, 144], sizes = [8, 16], strides = [1, 1]} : vector<8x192xf32> to vector<8x16xf32>
    %49 = vector.extract_strided_slice %26 {offsets = [0, 160], sizes = [8, 16], strides = [1, 1]} : vector<8x192xf32> to vector<8x16xf32>
    %50 = vector.extract_strided_slice %26 {offsets = [0, 176], sizes = [8, 16], strides = [1, 1]} : vector<8x192xf32> to vector<8x16xf32>
    %51 = vector.shape_cast %47 : vector<8x16xf32> to vector<1x8x16xf32>
    %52 = vector.shape_cast %48 : vector<8x16xf32> to vector<1x8x16xf32>
    %53 = vector.shape_cast %49 : vector<8x16xf32> to vector<1x8x16xf32>
    %54 = vector.shape_cast %50 : vector<8x16xf32> to vector<1x8x16xf32>
    %55 = tpu.concatenate %51, %52, %53, %54 in 0 : vector<1x8x16xf32>, vector<1x8x16xf32>, vector<1x8x16xf32>, vector<1x8x16xf32> -> vector<4x8x16xf32>
    %56 = arith.truncf %55 : vector<4x8x16xf32> to vector<4x8x16xbf16>
    "tpu.trace_start"() <{level = 10 : i32, message = "hqd,hkd->hqk"}> : () -> ()
    %cst_13 = arith.constant dense<0.000000e+00> : vector<4x8x8xf32>
    %57 = tpu.matmul %36, %46, %cst_13 {dimension_numbers = #tpu.dot_dimension_numbers<[2], [2], [1], [1], [0, 0, 0, 1, 1, 1], [0], [0]>} : vector<4x8x16xbf16>, vector<4x8x16xbf16>, vector<4x8x8xf32> -> vector<4x8x8xf32>
    "tpu.trace_stop"() : () -> ()
    %cst_14 = arith.constant dense<0xFF800000> : vector<4x8xf32>
    %58 = vector.multi_reduction <maximumf>, %57, %cst_14 [2] : vector<4x8x8xf32> to vector<4x8xf32>
    %59 = vector.shape_cast %58 : vector<4x8xf32> to vector<4x8x1xf32>
    %60 = vector.broadcast %59 : vector<4x8x1xf32> to vector<4x8x8xf32>
    %61 = arith.subf %57, %60 : vector<4x8x8xf32>
    %62 = math.exp %61 : vector<4x8x8xf32>
    %cst_15 = arith.constant dense<0.000000e+00> : vector<4x8xf32>
    %63 = vector.multi_reduction <add>, %62, %cst_15 [2] : vector<4x8x8xf32> to vector<4x8xf32>
    %64 = vector.shape_cast %63 : vector<4x8xf32> to vector<4x8x1xf32>
    %65 = tpu.reciprocal %64 {approx = true} : vector<4x8x1xf32> -> vector<4x8x1xf32>
    %66 = vector.broadcast %65 : vector<4x8x1xf32> to vector<4x8x8xf32>
    %67 = arith.mulf %62, %66 : vector<4x8x8xf32>
    %68 = arith.truncf %67 : vector<4x8x8xf32> to vector<4x8x8xbf16>
    "tpu.trace_start"() <{level = 10 : i32, message = "hqk,hkd->hqd"}> : () -> ()
    %cst_16 = arith.constant dense<0.000000e+00> : vector<4x8x16xf32>
    %69 = tpu.matmul %68, %56, %cst_16 {dimension_numbers = #tpu.dot_dimension_numbers<[2], [1], [1], [2], [0, 0, 0, 1, 1, 2], [0], [0]>} : vector<4x8x8xbf16>, vector<4x8x16xbf16>, vector<4x8x16xf32> -> vector<4x8x16xf32>
    "tpu.trace_stop"() : () -> ()
    %70 = vector.extract_strided_slice %69 {offsets = [0, 0, 0], sizes = [1, 8, 16], strides = [1, 1, 1]} : vector<4x8x16xf32> to vector<1x8x16xf32>
    %71 = vector.shape_cast %70 : vector<1x8x16xf32> to vector<8x16xf32>
    %72 = vector.extract_strided_slice %69 {offsets = [1, 0, 0], sizes = [1, 8, 16], strides = [1, 1, 1]} : vector<4x8x16xf32> to vector<1x8x16xf32>
    %73 = vector.shape_cast %72 : vector<1x8x16xf32> to vector<8x16xf32>
    %74 = vector.extract_strided_slice %69 {offsets = [2, 0, 0], sizes = [1, 8, 16], strides = [1, 1, 1]} : vector<4x8x16xf32> to vector<1x8x16xf32>
    %75 = vector.shape_cast %74 : vector<1x8x16xf32> to vector<8x16xf32>
    %76 = vector.extract_strided_slice %69 {offsets = [3, 0, 0], sizes = [1, 8, 16], strides = [1, 1, 1]} : vector<4x8x16xf32> to vector<1x8x16xf32>
    %77 = vector.shape_cast %76 : vector<1x8x16xf32> to vector<8x16xf32>
    %78 = tpu.concatenate %71, %73, %75, %77 in 1 : vector<8x16xf32>, vector<8x16xf32>, vector<8x16xf32>, vector<8x16xf32> -> vector<8x64xf32>
    %79 = arith.truncf %78 : vector<8x64xf32> to vector<8x64xbf16>
    %c0_17 = arith.constant 0 : index
    %c0_18 = arith.constant 0 : index
    %80 = vector.load %arg5[%c0_17, %c0_18] : memref<64x32xbf16, #tpu.memory_space<vmem>>, vector<64x32xbf16>
    %cst_19 = arith.constant dense<0.000000e+00> : vector<8x32xf32>
    %81 = tpu.matmul %79, %80, %cst_19 {dimension_numbers = #tpu.dot_dimension_numbers<[1], [0], [0], [1], [0, 0, 1, 1], [], []>} : vector<8x64xbf16>, vector<64x32xbf16>, vector<8x32xf32> -> vector<8x32xf32>
    %82 = arith.addf %1, %81 : vector<8x32xf32>
    %c0_20 = arith.constant 0 : index
    %c0_21 = arith.constant 0 : index
    %83 = vector.load %arg6[%c0_20, %c0_21] : memref<1x32xf32, #tpu.memory_space<vmem>>, vector<1x32xf32>
    %84 = vector.broadcast %83 : vector<1x32xf32> to vector<8x32xf32>
    %85 = arith.addf %82, %84 : vector<8x32xf32>
    %c0_22 = arith.constant 0 : index
    %c0_23 = arith.constant 0 : index
    %86 = vector.load %arg7[%c0_22, %c0_23] : memref<1x32xf32, #tpu.memory_space<vmem>>, vector<1x32xf32>
    %c0_24 = arith.constant 0 : index
    %c0_25 = arith.constant 0 : index
    %87 = vector.load %arg8[%c0_24, %c0_25] : memref<1x32xf32, #tpu.memory_space<vmem>>, vector<1x32xf32>
    %cst_26 = arith.constant dense<0.000000e+00> : vector<8xf32>
    %88 = vector.multi_reduction <add>, %85, %cst_26 [1] : vector<8x32xf32> to vector<8xf32>
    %89 = vector.shape_cast %88 : vector<8xf32> to vector<8x1xf32>
    %cst_27 = arith.constant 3.200000e+01 : f32
    %90 = vector.broadcast %cst_27 : f32 to vector<8x1xf32>
    %91 = arith.divf %89, %90 : vector<8x1xf32>
    %92 = vector.broadcast %91 : vector<8x1xf32> to vector<8x32xf32>
    %93 = arith.subf %85, %92 : vector<8x32xf32>
    %94 = arith.mulf %93, %93 : vector<8x32xf32>
    %cst_28 = arith.constant dense<0.000000e+00> : vector<8xf32>
    %95 = vector.multi_reduction <add>, %94, %cst_28 [1] : vector<8x32xf32> to vector<8xf32>
    %96 = vector.shape_cast %95 : vector<8xf32> to vector<8x1xf32>
    %cst_29 = arith.constant 3.200000e+01 : f32
    %97 = vector.broadcast %cst_29 : f32 to vector<8x1xf32>
    %98 = arith.divf %96, %97 : vector<8x1xf32>
    %cst_30 = arith.constant 9.99999974E-6 : f32
    %99 = vector.broadcast %cst_30 : f32 to vector<8x1xf32>
    %100 = arith.addf %98, %99 : vector<8x1xf32>
    %101 = math.rsqrt %100 : vector<8x1xf32>
    %102 = vector.broadcast %101 : vector<8x1xf32> to vector<8x32xf32>
    %103 = arith.mulf %93, %102 : vector<8x32xf32>
    %104 = vector.broadcast %86 : vector<1x32xf32> to vector<8x32xf32>
    %105 = arith.mulf %103, %104 : vector<8x32xf32>
    %106 = vector.broadcast %87 : vector<1x32xf32> to vector<8x32xf32>
    %107 = arith.addf %105, %106 : vector<8x32xf32>
    %108 = arith.truncf %107 : vector<8x32xf32> to vector<8x32xbf16>
    %c0_31 = arith.constant 0 : index
    %c0_32 = arith.constant 0 : index
    %109 = vector.load %arg9[%c0_31, %c0_32] : memref<32x64xbf16, #tpu.memory_space<vmem>>, vector<32x64xbf16>
    %cst_33 = arith.constant dense<0.000000e+00> : vector<8x64xf32>
    %110 = tpu.matmul %108, %109, %cst_33 {dimension_numbers = #tpu.dot_dimension_numbers<[1], [0], [0], [1], [0, 0, 1, 1], [], []>} : vector<8x32xbf16>, vector<32x64xbf16>, vector<8x64xf32> -> vector<8x64xf32>
    %c0_34 = arith.constant 0 : index
    %c0_35 = arith.constant 0 : index
    %111 = vector.load %arg10[%c0_34, %c0_35] : memref<1x64xf32, #tpu.memory_space<vmem>>, vector<1x64xf32>
    %112 = vector.broadcast %111 : vector<1x64xf32> to vector<8x64xf32>
    %113 = arith.addf %110, %112 : vector<8x64xf32>
    %cst_36 = arith.constant 5.000000e-01 : f32
    %114 = vector.broadcast %cst_36 : f32 to vector<8x64xf32>
    %115 = arith.mulf %114, %113 : vector<8x64xf32>
    %cst_37 = arith.constant 4.471500e-02 : f32
    %116 = vector.broadcast %cst_37 : f32 to vector<8x64xf32>
    %117 = arith.mulf %116, %113 : vector<8x64xf32>
    %118 = arith.mulf %117, %113 : vector<8x64xf32>
    %119 = arith.mulf %118, %113 : vector<8x64xf32>
    %120 = arith.addf %113, %119 : vector<8x64xf32>
    %cst_38 = arith.constant 0.797884583 : f32
    %121 = vector.broadcast %cst_38 : f32 to vector<8x64xf32>
    %122 = arith.mulf %121, %120 : vector<8x64xf32>
    %123 = math.tanh %122 : vector<8x64xf32>
    %cst_39 = arith.constant 1.000000e+00 : f32
    %124 = vector.broadcast %cst_39 : f32 to vector<8x64xf32>
    %125 = arith.addf %124, %123 : vector<8x64xf32>
    %126 = arith.mulf %115, %125 : vector<8x64xf32>
    %127 = arith.truncf %126 : vector<8x64xf32> to vector<8x64xbf16>
    %c0_40 = arith.constant 0 : index
    %c0_41 = arith.constant 0 : index
    %128 = vector.load %arg11[%c0_40, %c0_41] : memref<64x32xbf16, #tpu.memory_space<vmem>>, vector<64x32xbf16>
    %cst_42 = arith.constant dense<0.000000e+00> : vector<8x32xf32>
    %129 = tpu.matmul %127, %128, %cst_42 {dimension_numbers = #tpu.dot_dimension_numbers<[1], [0], [0], [1], [0, 0, 1, 1], [], []>} : vector<8x64xbf16>, vector<64x32xbf16>, vector<8x32xf32> -> vector<8x32xf32>
    %c0_43 = arith.constant 0 : index
    %c0_44 = arith.constant 0 : index
    %130 = vector.load %arg12[%c0_43, %c0_44] : memref<1x32xf32, #tpu.memory_space<vmem>>, vector<1x32xf32>
    %131 = vector.broadcast %130 : vector<1x32xf32> to vector<8x32xf32>
    %132 = arith.addf %129, %131 : vector<8x32xf32>
    %133 = arith.addf %85, %132 : vector<8x32xf32>
    %c0_45 = arith.constant 0 : index
    %c0_46 = arith.constant 0 : index
    %c0_47 = arith.constant 0 : index
    %134 = vector.load %arg13[%c0_45, %c0_46, %c0_47] : memref<1x8x32xf32, #tpu.memory_space<vmem>>, vector<1x8x32xf32>
    %135 = vector.shape_cast %134 : vector<1x8x32xf32> to vector<8x32xf32>
    %136 = vector.shape_cast %133 : vector<8x32xf32> to vector<1x8x32xf32>
    tpu.vector_store %arg13[%c0_45, %c0_46, %c0_47], %136 {strides = array<i32>} : memref<1x8x32xf32, #tpu.memory_space<vmem>>, vector<1x8x32xf32>,
    return
  }
  func.func @transform_0(%arg0: i32) -> (i32, i32, i32) {
    %c0_i32 = arith.constant 0 : i32
    %c0_i32_0 = arith.constant 0 : i32
    %c0_i32_1 = arith.constant 0 : i32
    return %arg0, %c0_i32, %c0_i32_0 : i32, i32, i32
  }
  func.func @transform_1(%arg0: i32) -> (i32, i32) {
    %c0_i32 = arith.constant 0 : i32
    %c0_i32_0 = arith.constant 0 : i32
    %c0_i32_1 = arith.constant 0 : i32
    return %c0_i32, %c0_i32_0 : i32, i32
  }
  func.func @transform_2(%arg0: i32) -> (i32, i32) {
    %c0_i32 = arith.constant 0 : i32
    %c0_i32_0 = arith.constant 0 : i32
    %c0_i32_1 = arith.constant 0 : i32
    return %c0_i32, %c0_i32_0 : i32, i32
  }
  func.func @transform_3(%arg0: i32) -> (i32, i32) {
    %c0_i32 = arith.constant 0 : i32
    %c0_i32_0 = arith.constant 0 : i32
    %c0_i32_1 = arith.constant 0 : i32
    return %c0_i32, %c0_i32_0 : i32, i32
  }
  func.func @transform_4(%arg0: i32) -> (i32, i32) {
    %c0_i32 = arith.constant 0 : i32
    %c0_i32_0 = arith.constant 0 : i32
    %c0_i32_1 = arith.constant 0 : i32
    return %c0_i32, %c0_i32_0 : i32, i32
  }
  func.func @transform_5(%arg0: i32) -> (i32, i32) {
    %c0_i32 = arith.constant 0 : i32
    %c0_i32_0 = arith.constant 0 : i32
    %c0_i32_1 = arith.constant 0 : i32
    return %c0_i32, %c0_i32_0 : i32, i32
  }
  func.func @transform_6(%arg0: i32) -> (i32, i32) {
    %c0_i32 = arith.constant 0 : i32
    %c0_i32_0 = arith.constant 0 : i32
    %c0_i32_1 = arith.constant 0 : i32
    return %c0_i32, %c0_i32_0 : i32, i32
  }
  func.func @transform_7(%arg0: i32) -> (i32, i32) {
    %c0_i32 = arith.constant 0 : i32
    %c0_i32_0 = arith.constant 0 : i32
    %c0_i32_1 = arith.constant 0 : i32
    return %c0_i32, %c0_i32_0 : i32, i32
  }
  func.func @transform_8(%arg0: i32) -> (i32, i32) {
    %c0_i32 = arith.constant 0 : i32
    %c0_i32_0 = arith.constant 0 : i32
    %c0_i32_1 = arith.constant 0 : i32
    return %c0_i32, %c0_i32_0 : i32, i32
  }
  func.func @transform_9(%arg0: i32) -> (i32, i32) {
    %c0_i32 = arith.constant 0 : i32
    %c0_i32_0 = arith.constant 0 : i32
    %c0_i32_1 = arith.constant 0 : i32
    return %c0_i32, %c0_i32_0 : i32, i32
  }
  func.func @transform_10(%arg0: i32) -> (i32, i32) {
    %c0_i32 = arith.constant 0 : i32
    %c0_i32_0 = arith.constant 0 : i32
    %c0_i32_1 = arith.constant 0 : i32
    return %c0_i32, %c0_i32_0 : i32, i32
  }
  func.func @transform_11(%arg0: i32) -> (i32, i32) {
    %c0_i32 = arith.constant 0 : i32
    %c0_i32_0 = arith.constant 0 : i32
    %c0_i32_1 = arith.constant 0 : i32
    return %c0_i32, %c0_i32_0 : i32, i32
  }
  func.func @transform_12(%arg0: i32) -> (i32, i32, i32) {
    %c0_i32 = arith.constant 0 : i32
    %c0_i32_0 = arith.constant 0 : i32
    %c0_i32_1 = arith.constant 0 : i32
    return %arg0, %c0_i32, %c0_i32_0 : i32, i32, i32
  }
}

</mosaic_0001>

<bundles_post_ra>
// kernel: tpu_custom_call.1
= control target key start
LH: loop header
LB: loop body
LE: loop exit
PB: predicated region body
PF: predicated region fallthrough
CT: control target
= control target key end

     0   :  { %s1975_s0 = inlined_call_operand.vmem [shape: f32[2,8,32], index: 0, kind: input, shape index: {}]   ;;  %s1976_s1 = inlined_call_operand.vmem [shape: f32[1,32], index: 1, kind: input, shape index: {}]   ;;  %s1977_s2 = inlined_call_operand.vmem [shape: f32[1,32], index: 2, kind: input, shape index: {}]   ;;  %s1978_s3 = inlined_call_operand.vmem [shape: bf16[32,192], index: 3, kind: input, shape index: {}]   ;;  %s1979_s4 = inlined_call_operand.vmem [shape: bf16[64,32], index: 4, kind: input, shape index: {}]   ;;  %s1980_s5 = inlined_call_operand.vmem [shape: f32[1,32], index: 5, kind: input, shape index: {}]   ;;  %s1981_s6 = inlined_call_operand.vmem [shape: f32[1,32], index: 6, kind: input, shape index: {}]   ;;  %s1982_s7 = inlined_call_operand.vmem [shape: f32[1,32], index: 7, kind: input, shape index: {}]   ;;  %s1983_s8 = inlined_call_operand.vmem [shape: bf16[32,64], index: 8, kind: input, shape index: {}]   ;;  %s1984_s9 = inlined_call_operand.vmem [shape: f32[1,64], index: 9, kind: input, shape index: {}]   ;;  %s1985_s10 = inlined_call_operand.vmem [shape: bf16[64,32], index: 10, kind: input, shape index: {}]   ;;  %s1986_s11 = inlined_call_operand.vmem [shape: f32[1,32], index: 11, kind: input, shape index: {}]   ;;  %s1987_s12 = inlined_call_operand.hbm [shape: f32[2,8,32], index: 12, kind: output, shape index: {}]  }
   0x1   :  { %1988 = sst [smem:[#allocation5_spill]] %s1975_s0 }
   0x2   :  { %1989 = sst [smem:[#allocation6_spill]] %s1976_s1 }
   0x3   :  { %17 = vsyncpa [#allocation3], 0 }
   0x4   :  { %19 = vsyncpa [#allocation3 + $0x1], 0  ;;  %s1714_s21 = smov 0   ;;  %s1716_s22 = smov 0  }
   0x5   :  { %s1718_s23 = smov 0   ;;  %s1720_s24 = smov 0  }
   0x6 LB: > { %s1735_s25 = sadd.s32 4294967295, %s1636_s24   ;;  %s1335_s26 = sadd.s32 4294967294, %s1636_s24   ;;  %s1636_s24 = sphi %s1720_s24, %s1997_s24   ;;  %s1632_s23 = sphi %s1718_s23, %s1996_s23   ;;  %s1628_s22 = sphi %s1716_s22, %s1995_s22   ;;  %s1624_s21 = sphi %s1714_s21, %s1994_s21  }
   0x7   : > { %s1739_s27 = sadd.s32 1, %s1636_s24   ;;  %s289_s28 = sadd.s32 1, %s1632_s23 }
   0x8   : > { %s286_s29 = ssub.s32 %s1636_s24, %s1739_s27  ;;  %p299_p0 = scmp.ne.s32.totalorder %s1632_s23, %s1628_s22 }
   0x9   : > { %p287_p1 = scmp.eq.s32.totalorder %s286_s29, 0  ;;  %p300_p2 = scmp.eq.s32.totalorder %s1735_s25, 1 }
   0xa   : > { %p305_p3 = scmp.ne.s32.totalorder %s1628_s22, %s1624_s21  ;;  %p306_p4 = scmp.eq.s32.totalorder %s1335_s26, 1 }
   0xb   : > { %s1750_s30 = scalar_select %p287_p1, %s1632_s23, %s289_s28  }
   0xc   : > { %p1752_p5 = por %p300_p2, %p299_p0  ;;  %p1756_p6 = por %p306_p4, %p305_p3 }
   0xd   : > { %p1338_p7 = scmp.ge.s32.totalorder %s1636_s24, 1  ;;  %p364_p8 = scmp.lt.s32.totalorder %s1636_s24, 3 }
   0xf   : > { %p365_p9 = pnand %p1338_p7, %p364_p8 }
  0x10   : > { %p405_p10 = scmp.lt.s32.totalorder (!%p365_p9), %s1735_s25, 1  ;;  %vm413_vm0 = vcmask (!%p365_p9), 261120   ;;  %s1992_s0 = sld [smem:[#allocation5_spill]] (!%p365_p9)  ;;  %v1536_v7 = vld [vmem:[%s1978_s3 + $0x4] ss:$8 sps:$4 sm:$0xff] (!%p365_p9)   ;;  %v1638_v10 = vmov (!%p365_p9), 0  }
  0x11   : > { %368 = sbr.rel (%p365_p9) target bundleno = 2664 (0xa68), region = 68  ;;  %v1538_v8 = vld [vmem:[%s1978_s3] ss:$8 sps:$4 sm:$0xff] (!%p365_p9)   ;;  %v1539_v9 = vld [vmem:[%s1978_s3 + $0x14] ss:$8 sps:$4 sm:$0xff] (!%p365_p9)   ;;  %470 = vmatprep.subr.bf16.mxu1 (!%p365_p9), %v1536_v7  ;;  %502 = vmatprep.mubr.bf16.mxu1 (!%p365_p9), %v1638_v10  ;;  %s1993_s1 = sld [smem:[#allocation6_spill]] (!%p365_p9) }
  0x12   : > { %471 = vmatpush1.bf16.msra.mxu1 (!%p365_p9), %v1538_v8  ;;  %v1541_v11 = vld [vmem:[%s1978_s3 + $0x10] ss:$8 sps:$4 sm:$0xff] (!%p365_p9)   ;;  %v1342_v18 = vld [vmem:[%s1977_s2] ss:$0 sm:$0xff] (!%p365_p9)  ;;  %v1639_v22 = vmov (!%p365_p9), 0.0   ;;  %vm1640_vm1 = vmmov (!%p365_p9), 0  }
  0x13   : > { %472 = vmatprep.subr.bf16.mxu1 (!%p365_p9), %v1539_v9  ;;  %1413 = vmatprep.subr.bf16.mxu0 (!%p365_p9), %v1639_v22  ;;  %s1641_s29 = smov (!%p365_p9), 80   ;;  %s1644_s17 = smov (!%p365_p9), 64   ;;  %vm542_vm2 = vcmask (!%p365_p9), 130048   ;;  %vm788_vm3 = vcmask (!%p365_p9), 1043456   ;;  %vm736_vm4 = vcmask (!%p365_p9), 64512   ;;  %vm984_vm5 = vcmask (!%p365_p9), 392192  }
  0x14   : > { %1415 = vmatprep.mubr.msk.bf16.mxu0 (!%p365_p9), %vm1640_vm1, %v1639_v22  ;;  %s1646_s18 = smov (!%p365_p9), 32   ;;  %vm1019_vm6 = vcmask (!%p365_p9), 523264   ;;  %s402_s28 = sand.u32 (!%p365_p9), 1, %s1628_s22  }
  0x16   : > { %473 = vmatpush1.bf16.msra.mxu1 (!%p365_p9), %v1541_v11 }
  0x17   : > { %v1341_v16 = vld [vmem:[%s1993_s1] ss:$0 sm:$0xff] (!%p365_p9)  ;;  %1407 = vmatprep.subr.bf16.mxu1 (!%p365_p9), %v1639_v22 }
  0x18   : > { %s406_s15 = scalar_select %p405_p10, %s1735_s25, 1 }
  0x1a   : > { %s1340_s16 = sshll.u32 %s406_s15, 3  ;;  %s1642_s15 = smov 112  }
  0x1b   : > { %s408_s19 = scalar_lea.vmem %s1992_s0, %s1340_s16  ;;  %s1643_s16 = smov 96  }
  0x1c   : > { %v1767_v0 = vld [vmem:[%s408_s19] sm:$0xff]  ;;  %s1647_s19 = smov 48  }
  0x1d   : > { %v414_v1 = vsel %vm413_vm0, %v1767_v0, 0.0 }
  0x1e   : > { %415 = vadd.xlane.f32.xlu0 %v414_v1 }
  0xab   : > { %v416_v2 = vpop.xlane.xlu0 %415 }
  0xac   : > { %v418_v3 = vmul.f32 0.03125, %v416_v2 }
  0xae   : > { %v419_v4 = vsub.f32 %v1767_v0, %v418_v3 }
  0xb0   : > { %v420_v5 = vmul.f32 %v419_v4, %v419_v4 }
  0xb2   : > { %v421_v6 = vsel %vm413_vm0, %v420_v5, 0.0 }
  0xb3   : > { %422 = vadd.xlane.f32.xlu0 %v421_v6 }
 0x140   : > { %v423_v12 = vpop.xlane.xlu0 %422 }
 0x141   : > { %v424_v13 = vmul.f32 0.03125, %v423_v12 }
 0x143   : > { %v425_v14 = vadd.f32 1e-05, %v424_v13 }
 0x145   : > { %1552 = vrsqrt.f32 %v425_v14 }
 0x14f   : > { %v1553_v15 = vpop.eup %1552 }
 0x150   : > { %v427_v17 = vmul.f32 %v1553_v15, %v419_v4 }
 0x152   : > { %v434_v19 = vmul.f32 %v1341_v16, %v427_v17 }
 0x154   : > { %v441_v20 = vadd.f32 %v1342_v18, %v434_v19 }
 0x156   : > { %v442_v21 = vpack.c.bf16 %v441_v20, %v441_v20 }
 0x158   : > { %1347 = vmatmul.mubr.msk.bf16.vlgmr.msra.gmra.mrb[0].mxu1 %vm413_vm0, %v442_v21 }
 0x159   : > { %1409 = vmatprep.mubr.msk.bf16.mxu1 %vm1640_vm1, %v1639_v22 }
 0x22b   : > { %v504_v23 = vpop.f32.mrb[0].mxu1 }
 0x22c   : > { %518 = vrot.lane.b32.xlu0 %v504_v23, %s1641_s29  ;;  %512 = vrot.lane.b32.xlu1 %v504_v23, %s1642_s15  ;;  %v1800_v24 = vpop.f32.mrb[1].mxu1  ;;  %v521_v27 = vpack.c.bf16 %v504_v23, %v504_v23 }
 0x22d   : > { %v508_v25 = vpop.f32.mrb[2].mxu1  ;;  %v535_v42 = vpack.c.bf16 %v1800_v24, %v1800_v24 }
 0x22e   : > { %v509_v26 = vpop.f32.mrb[3].mxu1 }
 0x22f   : > { %v790_v43 = vsel %vm788_vm3, %v535_v42, 0 }
 0x230   : > { %515 = vrot.lane.b32.xlu1 %v504_v23, %s1643_s16 }
 0x234   : > { %540 = vrot.lane.b32.xlu1 %v521_v27, %s1644_s17 }
 0x29e   : > { %v513_v28 = vpop.permute.xlu1 %512  ;;  %v519_v32 = vpop.permute.xlu0 %518 }
 0x29f   : > { %v522_v29 = vpack.c.bf16 %v513_v28, %v513_v28  ;;  %v524_v34 = vpack.c.bf16 %v519_v32, %v519_v32 }
 0x2a1   : > { %590 = vrot.lane.b32.xlu1 %v522_v29, %s1644_s17 }
 0x2a2   : > { %v516_v30 = vpop.permute.xlu1 %515 }
 0x2a3   : > { %v523_v31 = vpack.c.bf16 %v516_v30, %v516_v30 }
 0x2a5   : > { %639 = vrot.lane.b32.xlu1 %v523_v31, %s1644_s17 }
 0x2a6   : > { %v541_v33 = vpop.permute.xlu1 %540 }
 0x2a7   : > { %v547_v35 = vsel %vm542_vm2, %v541_v33, 0 }
 0x2a8   : > { %1408 = vmatpush3.bf16.xpose.msra.mxu1 %v547_v35 }
 0x2a9   : > { %688 = vrot.lane.b32.xlu1 %v524_v34, %s1644_s17  ;;  %1419 = vmatprep.subr.bf16.mxu1 %v1639_v22  ;;  %s1645_s17 = smov 16  }
 0x2af   : > { %1410 = vmatmul.mubr.msk.bf16.vlgmr.msra.gmra.mrb[4].mxu1 %vm542_vm2, %v521_v27 }
 0x2b0   : > { %1421 = vmatprep.mubr.msk.bf16.mxu1 %vm1640_vm1, %v1639_v22 }
 0x313   : > { %v591_v36 = vpop.permute.xlu1 %590 }
 0x314   : > { %v596_v37 = vsel %vm542_vm2, %v591_v36, 0 }
 0x315   : > { %1414 = vmatpush3.bf16.xpose.msra.mxu0 %v596_v37 }
 0x316   : > { %1425 = vmatprep.subr.bf16.mxu0 %v1639_v22 }
 0x317   : > { %v640_v38 = vpop.permute.xlu1 %639 }
 0x318   : > { %v645_v39 = vsel %vm542_vm2, %v640_v38, 0 }
 0x319   : > { %1420 = vmatpush3.bf16.xpose.msra.mxu1 %v645_v39 }
 0x31a   : > { %1431 = vmatprep.subr.bf16.mxu1 %v1639_v22 }
 0x31b   : > { %v689_v40 = vpop.permute.xlu1 %688 }
 0x31c   : > { %v694_v41 = vsel %vm542_vm2, %v689_v40, 0  ;;  %1416 = vmatmul.mubr.msk.bf16.vlgmr.msra.gmra.mrb[0].mxu0 %vm542_vm2, %v522_v29 }
 0x31d   : > { %1426 = vmatpush3.bf16.xpose.msra.mxu0 %v694_v41  ;;  %1427 = vmatprep.mubr.msk.bf16.mxu0 %vm1640_vm1, %v1639_v22 }
 0x31e   : > { %1437 = vmatprep.subr.bf16.mxu0 %v1639_v22 }
 0x320   : > { %1422 = vmatmul.mubr.msk.bf16.vlgmr.msra.gmra.mrb[8].mxu1 %vm542_vm2, %v523_v31 }
 0x321   : > { %1432 = vmatpush3.bf16.msra.mxu1 %v790_v43  ;;  %1433 = vmatprep.mubr.msk.bf16.mxu1 %vm1640_vm1, %v1639_v22 }
 0x322   : > { %1443 = vmatprep.subr.bf16.mxu1 %v1639_v22 }
 0x324   : > { %1428 = vmatmul.mubr.msk.bf16.vlgmr.msra.gmra.mrb[4].mxu0 %vm542_vm2, %v524_v34 }
 0x325   : > { %1439 = vmatprep.mubr.msk.bf16.mxu0 %vm1640_vm1, %v1639_v22 }
 0x382   : > { %v583_v44 = vpop.f32.mrb[4].mxu1 }
 0x383   : > { %v1411_v45 = vpop.f32.mrb[5].mxu1  ;;  %v737_v46 = vsel %vm736_vm4, %v583_v44, -inf }
 0x384   : > { %738 = vmax.xlane.f32.xlu1 %v737_v46  ;;  %v586_v47 = vpop.f32.mrb[6].mxu1 }
 0x385   : > { %v1412_v48 = vpop.f32.mrb[7].mxu1  ;;  %v1542_v47 = vld [vmem:[%s1979_s4] sm:$0xff]  }
 0x3ef   : > { %v632_v49 = vpop.f32.mrb[0].mxu0 }
 0x3f0   : > { %v1417_v50 = vpop.f32.mrb[1].mxu0  ;;  %v740_v51 = vsel %vm736_vm4, %v632_v49, -inf }
 0x3f1   : > { %741 = vmax.xlane.f32.xlu0 %v740_v51  ;;  %v635_v52 = vpop.f32.mrb[2].mxu0 }
 0x3f2   : > { %v1418_v53 = vpop.f32.mrb[3].mxu0  ;;  %v1543_v52 = vld [vmem:[%s1979_s4 + $0x8] sm:$0xff]  }
 0x3f3   : > { %v681_v54 = vpop.f32.mrb[8].mxu1  ;;  %v1544_v53 = vld [vmem:[%s1979_s4 + $0x10] sm:$0xff]  }
 0x3f4   : > { %v1423_v55 = vpop.f32.mrb[9].mxu1  ;;  %v743_v56 = vsel %vm736_vm4, %v681_v54, -inf }
 0x3f5   : > { %744 = vmax.xlane.f32.xlu1 %v743_v56  ;;  %v684_v57 = vpop.f32.mrb[10].mxu1 }
 0x3f6   : > { %v1424_v58 = vpop.f32.mrb[11].mxu1 }
 0x3f7   : > { %v730_v59 = vpop.f32.mrb[4].mxu0 }
 0x3f8   : > { %v1429_v60 = vpop.f32.mrb[5].mxu0  ;;  %v746_v61 = vsel %vm736_vm4, %v730_v59, -inf }
 0x3f9   : > { %747 = vmax.xlane.f32.xlu0 %v746_v61  ;;  %v733_v62 = vpop.f32.mrb[6].mxu0 }
 0x3fa   : > { %v1430_v63 = vpop.f32.mrb[7].mxu0 }
 0x406   : > { %526 = vrot.lane.b32.xlu1 %v1800_v24, %s1642_s15  ;;  %s1648_s15 = smov [#allocation2]  }
 0x411   : > { %v739_v1 = vpop.xlane.xlu1 %738 }
 0x412   : > { %v749_v2 = vsub.f32 %v583_v44, %v739_v1 }
 0x414   : > { %v753_v3 = vmul.f32 1.442695, %v749_v2 }
 0x416   : > { %1554 = vpow2.f32 %v753_v3 }
 0x420   : > { %v1555_v4 = vpop.eup %1554 }
 0x421   : > { %v761_v5 = vsel %vm736_vm4, %v1555_v4, 0.0 }
 0x42a   : > { %762 = vadd.xlane.f32.xlu1 %v761_v5 }
 0x47e   : > { %v742_v6 = vpop.xlane.xlu0 %741 }
 0x47f   : > { %v750_v7 = vsub.f32 %v632_v49, %v742_v6 }
 0x481   : > { %v755_v8 = vmul.f32 1.442695, %v750_v7 }
 0x482   : > { %v745_v9 = vpop.xlane.xlu1 %744 }
 0x483   : > { %1556 = vpow2.f32 %v755_v8  ;;  %v751_v10 = vsub.f32 %v681_v54, %v745_v9  ;;  %v1545_v54 = vld [vmem:[%s1979_s4 + $0x18] sm:$0xff]  }
 0x485   : > { %v757_v11 = vmul.f32 1.442695, %v751_v10 }
 0x486   : > { %v748_v12 = vpop.xlane.xlu0 %747  ;;  %v527_v13 = vpop.permute.xlu1 %526 }
 0x487   : > { %1558 = vpow2.f32 %v757_v11  ;;  %v752_v14 = vsub.f32 %v730_v59, %v748_v12  ;;  %v536_v15 = vpack.c.bf16 %v527_v13, %v527_v13  ;;  %v1361_v12 = vld [vmem:[%s1980_s5] ss:$0 sm:$0xff] }
 0x489   : > { %v759_v16 = vmul.f32 1.442695, %v752_v14  ;;  %v836_v17 = vsel %vm788_vm3, %v536_v15, 0 }
 0x48a   : > { %1438 = vmatpush3.bf16.msra.mxu0 %v836_v17 }
 0x48b   : > { %1560 = vpow2.f32 %v759_v16  ;;  %1449 = vmatprep.subr.bf16.mxu0 %v1639_v22 }
 0x48d   : > { %v1557_v18 = vpop.eup %1556 }
 0x48e   : > { %v764_v19 = vsel %vm736_vm4, %v1557_v18, 0.0 }
 0x48f   : > { %765 = vadd.xlane.f32.xlu0 %v764_v19 }
 0x491   : > { %v1559_v20 = vpop.eup %1558 }
 0x492   : > { %v767_v21 = vsel %vm736_vm4, %v1559_v20, 0.0 }
 0x493   : > { %768 = vadd.xlane.f32.xlu1 %v767_v21 }
 0x495   : > { %v1561_v23 = vpop.eup %1560 }
 0x496   : > { %v770_v25 = vsel %vm736_vm4, %v1561_v23, 0.0 }
 0x497   : > { %771 = vadd.xlane.f32.xlu0 %v770_v25 }
 0x4a4   : > { %532 = vrot.lane.b32.xlu1 %v1800_v24, %s1641_s29  ;;  %s1339_s29 = sshll.u32 %s402_s28, 3 }
 0x4ad   : > { %529 = vrot.lane.b32.xlu0 %v1800_v24, %s1643_s16  ;;  %s1578_s16 = sshll.u32 %s1648_s15, 4  ;;  %s1579_s16 = int_to_ptr.vmem [resolvable:$false] %s1578_s16 }
 0x4ae   : > { %s1580_s1 = scalar_lea.vmem %s1579_s16, 256 }
 0x4b7   : > { %v763_v26 = vpop.xlane.xlu1 %762 }
 0x4b8   : > { %1562 = vrcp.f32 %v763_v26  ;;  %v1547_v26 = vld [vmem:[%s1983_s8 + $0x8] sm:$0xff]  }
 0x4c2   : > { %v1563_v27 = vpop.eup %1562 }
 0x4c3   : > { %v777_v28 = vmul.f32 %v1563_v27, %v1555_v4 }
 0x4c5   : > { %v781_v29 = vpack.c.bf16 %v777_v28, %v777_v28 }
 0x4c7   : > { %1434 = vmatmul.mubr.msk.bf16.vlgmr.msra.gmra.mrb[12].mxu1 %vm736_vm4, %v781_v29 }
 0x4c8   : > { %1445 = vmatprep.mubr.msk.bf16.mxu1 %vm1640_vm1, %v1639_v22 }
 0x51c   : > { %v766_v30 = vpop.xlane.xlu0 %765 }
 0x51d   : > { %1564 = vrcp.f32 %v766_v30 }
 0x520   : > { %v769_v31 = vpop.xlane.xlu1 %768 }
 0x521   : > { %1566 = vrcp.f32 %v769_v31  ;;  %v1362_v31 = vld [vmem:[%s1981_s6] ss:$0 sm:$0xff] }
 0x524   : > { %v772_v32 = vpop.xlane.xlu0 %771  ;;  %v533_v33 = vpop.permute.xlu1 %532 }
 0x525   : > { %1568 = vrcp.f32 %v772_v32  ;;  %v538_v24 = vpack.c.bf16 %v533_v33, %v533_v33  ;;  %v1363_v33 = vld [vmem:[%s1982_s7] ss:$0 sm:$0xff] }
 0x527   : > { %v1565_v34 = vpop.eup %1564  ;;  %v928_v42 = vsel %vm788_vm3, %v538_v24, 0 }
 0x528   : > { %v778_v35 = vmul.f32 %v1565_v34, %v1557_v18  ;;  %v530_v36 = vpop.permute.xlu0 %529 }
 0x529   : > { %v537_v37 = vpack.c.bf16 %v530_v36, %v530_v36  ;;  %v1548_v36 = vld [vmem:[%s1985_s10] sm:$0xff]  }
 0x52a   : > { %v782_v38 = vpack.c.bf16 %v778_v35, %v778_v35 }
 0x52b   : > { %v1567_v39 = vpop.eup %1566  ;;  %v882_v40 = vsel %vm788_vm3, %v537_v37, 0  ;;  %v1549_v37 = vld [vmem:[%s1985_s10 + $0x8] sm:$0xff]  }
 0x52c   : > { %v779_v41 = vmul.f32 %v1567_v39, %v1559_v20  ;;  %1440 = vmatmul.mubr.msk.bf16.vlgmr.msra.gmra.mrb[8].mxu0 %vm736_vm4, %v782_v38  ;;  %1444 = vmatpush3.bf16.msra.mxu1 %v882_v40  ;;  %v1550_v38 = vld [vmem:[%s1985_s10 + $0x10] sm:$0xff]   ;;  %v1551_v39 = vld [vmem:[%s1985_s10 + $0x18] sm:$0xff]   ;;  %v1364_v40 = vld [vmem:[%s1984_s9] ss:$0 sm:$0xff] }
 0x52d   : > { %1450 = vmatpush3.bf16.msra.mxu0 %v928_v42  ;;  %1451 = vmatprep.mubr.msk.bf16.mxu0 %vm1640_vm1, %v1639_v22 }
 0x52e   : > { %v783_v43 = vpack.c.bf16 %v779_v41, %v779_v41  ;;  %1455 = vmatprep.subr.bf16.mxu1 %v1639_v22  ;;  %1467 = vmatprep.subr.bf16.mxu0 %v1639_v22 }
 0x52f   : > { %v1569_v44 = vpop.eup %1568 }
 0x530   : > { %v780_v45 = vmul.f32 %v1569_v44, %v1561_v23  ;;  %1446 = vmatmul.mubr.msk.bf16.vlgmr.msra.gmra.mrb[16].mxu1 %vm736_vm4, %v783_v43 }
 0x531   : > { %1463 = vmatprep.mubr.msk.bf16.mxu1 %vm1640_vm1, %v1639_v22  ;;  %1456 = vmatpush3.bf16.msra.mxu1 %v1542_v47 }
 0x532   : > { %v784_v46 = vpack.c.bf16 %v780_v45, %v780_v45  ;;  %1457 = vmatprep.subr.bf16.mxu1 %v1639_v22 }
 0x534   : > { %1452 = vmatmul.mubr.msk.bf16.vlgmr.msra.gmra.mrb[12].mxu0 %vm736_vm4, %v784_v46 }
 0x535   : > { %1471 = vmatprep.mubr.msk.bf16.mxu0 %vm1640_vm1, %v1639_v22  ;;  %1458 = vmatpush3.bf16.msra.mxu1 %v1543_v52 }
 0x536   : > { %1459 = vmatprep.subr.bf16.mxu1 %v1639_v22 }
 0x539   : > { %1460 = vmatpush3.bf16.msra.mxu1 %v1544_v53 }
 0x53a   : > { %1461 = vmatprep.subr.bf16.mxu1 %v1639_v22 }
 0x53d   : > { %1462 = vmatpush3.bf16.msra.mxu1 %v1545_v54 }
 0x59a   : > { %v826_v48 = vpop.f32.mrb[12].mxu1 }
 0x59b   : > { %v1435_v49 = vpop.f32.mrb[13].mxu1 }
 0x59c   : > { %v829_v50 = vpop.f32.mrb[14].mxu1 }
 0x59d   : > { %v1436_v51 = vpop.f32.mrb[15].mxu1 }
 0x5ff   : > { %v872_v55 = vpop.f32.mrb[8].mxu0 }
 0x600   : > { %971 = vrot.lane.b32.xlu1 %v872_v55, %s1645_s17  ;;  %v1441_v56 = vpop.f32.mrb[9].mxu0  ;;  %v1368_v55 = vld [vmem:[%s1986_s11] ss:$0 sm:$0xff]  ;;  %s1375_s17 = sshll.u32 %s1735_s25, 7  ;;  %s1263_s25 = scalar_lea.sflag [#allocation3], %s402_s28 }
 0x601   : > { %v875_v57 = vpop.f32.mrb[10].mxu0  ;;  %s1932_s0 = scalar_lea.hbm %s1987_s12, %s1375_s17 }
 0x602   : > { %v1442_v58 = vpop.f32.mrb[11].mxu0 }
 0x603   : > { %v918_v59 = vpop.f32.mrb[16].mxu1 }
 0x604   : > { %975 = vrot.lane.b32.xlu0 %v918_v59, %s1646_s18  ;;  %v1447_v60 = vpop.f32.mrb[17].mxu1  ;;  %s404_s18 = scalar_lea.vmem [#allocation2], %s1339_s29 }
 0x605   : > { %v921_v61 = vpop.f32.mrb[18].mxu1 }
 0x606   : > { %v1448_v62 = vpop.f32.mrb[19].mxu1 }
 0x607   : > { %v964_v63 = vpop.f32.mrb[12].mxu0 }
 0x608   : > { %979 = vrot.lane.b32.xlu1 %v964_v63, %s1647_s19  ;;  %v1453_v1 = vpop.f32.mrb[13].mxu0  ;;  %s1276_s19 = sshll.u32 %s404_s18, 4  ;;  %s1934_s19 = int_to_ptr.vmem [resolvable:$true] %s1276_s19 }
 0x609   : > { %v967_v2 = vpop.f32.mrb[14].mxu0  ;;  %s1574_s29 = scalar_lea.vmem %s1934_s19, 128  ;;  %p1581_p0 = scmp.lt.s32.totalorder %s1934_s19, %s1579_s16 }
 0x60a   : > { %v1454_v3 = vpop.f32.mrb[15].mxu0  ;;  %p1575_p11 = scmp.ne.s32.totalorder %s1934_s19, %s1574_s29  ;;  %p1582_p1 = scmp.lt.s32.totalorder %s1580_s1, %s1574_s29 }
 0x60c   : > { %p1576_p12 = pnand %p1575_p11, %p1752_p5  ;;  %p1583_p2 = por %p1582_p1, %p1581_p0 }
 0x60e   : > { %p1577_p13 = pneg %p1576_p12 }
 0x610   : > { %p1584_p3 = pnand %p1583_p2, %p1577_p13 }
 0x672   : > { %v972_v4 = vpop.permute.xlu1 %971 }
 0x673   : > { %v982_v6 = vsel %vm542_vm2, %v826_v48, %v972_v4 }
 0x676   : > { %v976_v5 = vpop.permute.xlu0 %975 }
 0x677   : > { %v983_v7 = vsel %vm413_vm0, %v982_v6, %v976_v5 }
 0x67a   : > { %v980_v8 = vpop.permute.xlu1 %979 }
 0x67b   : > { %v985_v9 = vsel %vm984_vm5, %v983_v7, %v980_v8 }
 0x67c   : > { %v986_v10 = vpack.c.bf16 %v985_v9, %v985_v9 }
 0x67e   : > { %1464 = vmatmul.mubr.msk.bf16.vlgmr.msra.gmra.mrb[20].mxu1 %vm1019_vm6, %v986_v10 }
 0x751   : > { %v1057_v11 = vpop.f32.mrb[20].mxu1 }
 0x752   : > { %v1063_v13 = vadd.f32 %v1057_v11, %v1767_v0  ;;  %v1465_v14 = vpop.f32.mrb[21].mxu1  ;;  %v1546_v0 = vld [vmem:[%s1983_s8] sm:$0xff]  }
 0x753   : > { %v1060_v15 = vpop.f32.mrb[22].mxu1  ;;  %1468 = vmatpush3.bf16.msra.mxu0 %v1546_v0 }
 0x754   : > { %v1881_v16 = vadd.f32 %v1361_v12, %v1063_v13  ;;  %v1466_v17 = vpop.f32.mrb[23].mxu1  ;;  %1469 = vmatprep.subr.bf16.mxu0 %v1639_v22 }
 0x756   : > { %v1074_v18 = vsel %vm413_vm0, %v1881_v16, 0.0 }
 0x757   : > { %1075 = vadd.xlane.f32.xlu0 %v1074_v18  ;;  %1470 = vmatpush3.bf16.msra.mxu0 %v1547_v26 }
 0x758   : > { %1475 = vmatprep.subr.bf16.mxu0 %v1639_v22 }
 0x7e4   : > { %v1076_v19 = vpop.xlane.xlu0 %1075 }
 0x7e5   : > { %v1077_v20 = vmul.f32 0.03125, %v1076_v19 }
 0x7e7   : > { %v1078_v21 = vsub.f32 %v1881_v16, %v1077_v20 }
 0x7e9   : > { %v1079_v23 = vmul.f32 %v1078_v21, %v1078_v21 }
 0x7eb   : > { %v1080_v25 = vsel %vm413_vm0, %v1079_v23, 0.0 }
 0x7ec   : > { %1081 = vadd.xlane.f32.xlu1 %v1080_v25 }
 0x879   : > { %v1082_v27 = vpop.xlane.xlu1 %1081 }
 0x87a   : > { %v1083_v28 = vmul.f32 0.03125, %v1082_v27 }
 0x87c   : > { %v1084_v29 = vadd.f32 1e-05, %v1083_v28 }
 0x87e   : > { %1570 = vrsqrt.f32 %v1084_v29 }
 0x888   : > { %v1571_v30 = vpop.eup %1570 }
 0x889   : > { %v1086_v32 = vmul.f32 %v1571_v30, %v1078_v21 }
 0x88b   : > { %v1093_v34 = vmul.f32 %v1362_v31, %v1086_v32 }
 0x88d   : > { %v1100_v35 = vadd.f32 %v1363_v33, %v1093_v34 }
 0x88f   : > { %v1101_v24 = vpack.c.bf16 %v1100_v35, %v1100_v35 }
 0x891   : > { %1472 = vmatmul.mubr.msk.bf16.vlgmr.msra.gmra.mrb[16].mxu0 %vm413_vm0, %v1101_v24 }
 0x892   : > { %1483 = vmatprep.mubr.msk.bf16.mxu0 %vm1640_vm1, %v1639_v22  ;;  %1476 = vmatpush3.bf16.msra.mxu0 %v1548_v36 }
 0x893   : > { %1477 = vmatprep.subr.bf16.mxu0 %v1639_v22 }
 0x896   : > { %1478 = vmatpush3.bf16.msra.mxu0 %v1549_v37 }
 0x897   : > { %1479 = vmatprep.subr.bf16.mxu0 %v1639_v22 }
 0x89a   : > { %1480 = vmatpush3.bf16.msra.mxu0 %v1550_v38 }
 0x89b   : > { %1481 = vmatprep.subr.bf16.mxu0 %v1639_v22 }
 0x89e   : > { %1482 = vmatpush3.bf16.msra.mxu0 %v1551_v39 }
 0x964   : > { %v1162_v41 = vpop.f32.mrb[16].mxu0 }
 0x965   : > { %v1163_v42 = vadd.f32 %v1364_v40, %v1162_v41  ;;  %v1473_v43 = vpop.f32.mrb[17].mxu0 }
 0x966   : > { %v1165_v44 = vpop.f32.mrb[18].mxu0 }
 0x967   : > { %v1169_v45 = vmul.f32 0.044715, %v1163_v42  ;;  %v1474_v46 = vpop.f32.mrb[19].mxu0  ;;  %v1168_v22 = vmul.f32 0.5, %v1163_v42 }
 0x969   : > { %v1170_v47 = vmul.f32 %v1169_v45, %v1163_v42 }
 0x96b   : > { %v1171_v48 = vmul.f32 %v1170_v47, %v1163_v42 }
 0x96d   : > { %v1172_v49 = vadd.f32 %v1171_v48, %v1163_v42 }
 0x96f   : > { %v1173_v50 = vmul.f32 0.7978846, %v1172_v49 }
 0x971   : > { %1572 = vtanh.f32 %v1173_v50 }
 0x97b   : > { %v1573_v51 = vpop.eup %1572 }
 0x97c   : > { %v1175_v52 = vadd.f32 1.0, %v1573_v51 }
 0x97e   : > { %v1176_v53 = vmul.f32 %v1175_v52, %v1168_v22 }
 0x980   : > { %v1177_v54 = vpack.c.bf16 %v1176_v53, %v1176_v53 }
 0x982   : > { %1484 = vmatmul.mubr.msk.bf16.vlgmr.msra.gmra.mrb[20].mxu0 %vm1019_vm6, %v1177_v54 }
 0xa55   : > { %v1254_v56 = vpop.f32.mrb[20].mxu0 }
 0xa56   : > { %v1255_v57 = vadd.f32 %v1368_v55, %v1254_v56  ;;  %v1485_v58 = vpop.f32.mrb[21].mxu0 }
 0xa57   : > { %v1257_v59 = vpop.f32.mrb[22].mxu0 }
 0xa58   : > { %v1260_v60 = vadd.f32 %v1255_v57, %v1881_v16  ;;  %v1486_v61 = vpop.f32.mrb[23].mxu0 }
 0xa5a   : > { %1261 = vst.msk [vmem:[%s404_s18] sm:$0xff] %vm413_vm0, %v1260_v60 }
 0xa5b   : > { %1587 = shalt.err (!%p1584_p3)
}
 0xa5c   : > { %s1588_s28 = scalar_lea.hbm %s1932_s0, 128  ;;  %s1592_s20 = scalar_lea.hbm %s1987_s12, 256 }
 0xa5d   : > { %p1589_p4 = scmp.ne.s32.totalorder %s1932_s0, %s1588_s28  ;;  %p1593_p9 = scmp.lt.u32.totalorder %s1932_s0, %s1987_s12 }
 0xa5e   : > { %p1594_p10 = scmp.lt.u32.totalorder %s1592_s20, %s1588_s28  ;;  %p1596_p12 = scmp.lt.u32.totalorder %s1588_s28, %s1932_s0 }
 0xa5f   : > { %p1590_p7 = pnand %p1589_p4, %p1752_p5 }
 0xa60   : > { %p1595_p11 = por %p1594_p10, %p1593_p9 }
 0xa61   : > { %p1591_p8 = pneg %p1590_p7 }
 0xa62   : > { %p1597_p13 = por %p1596_p12, %p1595_p11 }
 0xa64   : > { %p1598_p0 = pnand %p1597_p13, %p1591_p8 }
 0xa66   : > { %1601 = shalt.err (!%p1598_p0)
}
 0xa67   : > { %1487 = dma.vmem_to_hbm [thread:$0]  (%p1752_p5), %s1934_s19, 128, %s1932_s0, %s1263_s25  }
 0xa68 PF: > { %p1493_p1 = scmp.ge.s32.totalorder %s1636_s24, 2  ;;  %s1288_s1 = sand.u32 1, %s1624_s21  }
 0xa69   : > { %s1289_s29 = scalar_lea.sflag [#allocation3], %s1288_s1 }
 0xa6a   : > { %p1490_p2 = pnand %p1493_p1, %p1756_p6 }
 0xa6c   : > { %1619 = dma.done.wait (!%p1490_p2), %s1289_s29, 128  }
 0xa6d   : > { %1621 = vsyncadd (!%p1490_p2), %s1289_s29, 4294967168  ;;  %p22_p3 = scmp.ge.s32.totalorder %s1739_s27, 4   ;;  %s1994_s21 = smov %s1628_s22 }
 0xa6e   : > { %s1995_s22 = smov %s1632_s23  ;;  %s1996_s23 = smov %s1750_s30 }
 0xa6f   : > { %s1997_s24 = smov %s1739_s27  ;;  %24 = sbr.rel (!%p22_p3) target bundleno = 6 (0x6), region = 103 }
 0xa76   :  { %1294 = vsyncpa [#allocation3], 1 }
 0xa77   :  { %1296 = vsyncpa [#allocation3 + $0x1], 1 }

</bundles_post_ra>
